<compile_context>
chip_gen: v6e
topology: v6e:2x2x1
jax: 0.10.0
libtpu: 0.0.40
codegen_flags: <defaults>
</compile_context>

<pallas_src>
import math
import functools
import jax
import jax.numpy as jnp
from jax import lax
from jax.experimental import pallas as pl
from jax.experimental.pallas import tpu as pltpu


# --------------------- Kernel 1: fused QKV projection + phase ---------------

def _proj_kernel(x_ref, w_ref, tc_ref, ts_ref, q_ref, k_ref, v_ref, *, H):
    x = x_ref[0]                        # (Ts, H)
    w = w_ref[...]                      # (H, 3H) = [W_Q | W_K | W_V]
    tc = tc_ref[...]                    # (Ts, H)  cos((n+1)*theta)
    ts = ts_ref[...]                    # (Ts, H)  sin((n+1)*theta)

    p = jnp.dot(x, w, preferred_element_type=jnp.float32)    # (Ts, 3H)
    a = p[:, :H]            # X @ W_Q   (real)
    b = p[:, H:2 * H]       # X @ W_K   (real)
    v = p[:, 2 * H:]        # X @ W_V   (real)

    # Q = (X W_Q) * Theta,  K = (X W_K) * conj(Theta); pack [re | im] on lanes.
    q_ref[0] = jnp.concatenate([a * tc, a * ts], axis=-1)     # (Ts, 2H)
    k_ref[0] = jnp.concatenate([b * tc, -b * ts], axis=-1)    # (Ts, 2H)
    v_ref[0] = v                                              # (Ts, H)


# --------------------- Kernel 2: tiled retention attention ------------------

def _retention_attn_kernel(q_ref, k_ref, v_ref, out_ref, acc_ref,
                           *, H, Tq, Tk, log_gamma):
    qi = pl.program_id(1)
    ki = pl.program_id(2)
    nk = pl.num_programs(2)

    @pl.when(ki == 0)
    def _():
        acc_ref[...] = jnp.zeros_like(acc_ref)

    # Causal tile skip: key tile entirely in the future of this query tile
    # contributes nothing (D == 0 there).
    @pl.when(ki * Tk <= qi * Tq + (Tq - 1))
    def _():
        q = q_ref[0]                      # (Tq, 2H)  [q_re | q_im]
        k = k_ref[0]                      # (Tk, 2H)  [k_re | k_im]
        v = v_ref[0]                      # (Tk, H)
        q_re, q_im = q[:, :H], q[:, H:]
        k_re, k_im = k[:, :H], k[:, H:]

        # NT-style contraction over the hidden axis (no materialized K^T).
        nt = (((1,), (1,)), ((), ()))
        m1 = lax.dot_general(q_re, k_re, nt,
                             preferred_element_type=jnp.float32)
        m2 = lax.dot_general(q_im, k_im, nt,
                             preferred_element_type=jnp.float32)
        m3 = lax.dot_general(q_re + q_im, k_re + k_im, nt,
                             preferred_element_type=jnp.float32)
        att_re = m1 - m2                  # Karatsuba complex product
        att_im = m3 - m1 - m2

        # Decay matrix tile computed in-kernel (no (S,S) HBM input).
        n_idx = qi * Tq + lax.broadcasted_iota(jnp.int32, (Tq, Tk), 0)
        m_idx = ki * Tk + lax.broadcasted_iota(jnp.int32, (Tq, Tk), 1)
        diff = n_idx - m_idx
        # exp only on the clamped (non-negative) region, then mask -> no inf.
        dexp = jnp.exp(jnp.maximum(diff, 0).astype(jnp.float32) * log_gamma)
        d = jnp.where(diff >= 0, dexp, 0.0)

        # Row-stack re/im so att @ V is a single MXU matmul of height 2*Tq.
        p = jnp.concatenate([att_re * d, att_im * d], axis=0)   # (2Tq, Tk)
        acc_ref[...] += jnp.dot(p, v, preferred_element_type=jnp.float32)

    @pl.when(ki == nk - 1)
    def _():
        acc = acc_ref[...]                # (2Tq, H)
        # Lane-concat to a 2H-wide (lane-dense) output tile: [out_re | out_im].
        out_ref[0] = jnp.concatenate([acc[:Tq], acc[Tq:]], axis=-1)


# ------------------------------- Wrapper -------------------------------------

def _pick_tile(n, cap=256):
    """Largest tile <= cap that divides n and is sublane-friendly."""
    if n <= cap:
        return n
    for t in range(cap, 7, -1):
        if n % t == 0 and t % 8 == 0:
            return t
    return n  # fallback: single tile


def simple_retention_forward(x, w_q, w_k, w_v, theta, gamma):
    """x: (B, S, H) float32 -> (B, S, H) complex64 (matches torch forward)."""
    B, S, H = x.shape
    f32 = jnp.float32
    x = x.astype(f32)

    # Theta[n, h] = exp(i*(n+1)*theta[h]); precompute cos/sin (glue, O(S*H)).
    ns = jnp.arange(1, S + 1, dtype=f32)
    phase = ns[:, None] * theta.astype(f32)[None, :]
    tc = jnp.cos(phase)
    ts = jnp.sin(phase)

    # Fused projection weight (H, 3H) = [W_Q | W_K | W_V].
    w_qkv = jnp.concatenate([w_q, w_k, w_v], axis=1).astype(f32)

    Ts = _pick_tile(S)
    q_ri, k_ri, v = pl.pallas_call(
        functools.partial(_proj_kernel, H=H),
        out_shape=(jax.ShapeDtypeStruct((B, S, 2 * H), f32),
                   jax.ShapeDtypeStruct((B, S, 2 * H), f32),
                   jax.ShapeDtypeStruct((B, S, H), f32)),
        grid_spec=pltpu.PrefetchScalarGridSpec(
            num_scalar_prefetch=0,
            grid=(B, S // Ts),
            in_specs=[
                pl.BlockSpec((1, Ts, H), lambda b, s: (b, s, 0)),     # X
                pl.BlockSpec((H, 3 * H), lambda b, s: (0, 0)),        # W_qkv
                pl.BlockSpec((Ts, H), lambda b, s: (s, 0)),           # cos
                pl.BlockSpec((Ts, H), lambda b, s: (s, 0)),           # sin
            ],
            out_specs=[
                pl.BlockSpec((1, Ts, 2 * H), lambda b, s: (b, s, 0)),
                pl.BlockSpec((1, Ts, 2 * H), lambda b, s: (b, s, 0)),
                pl.BlockSpec((1, Ts, H), lambda b, s: (b, s, 0)),
            ]),
        compiler_params=pltpu.CompilerParams(
            dimension_semantics=("parallel", "parallel")),
    )(x, w_qkv, tc, ts)

    T = _pick_tile(S)                     # Tq == Tk == T
    nq = S // T
    nk = S // T
    # gamma is a static hyperparameter (> 0); bake log(gamma) into the kernel.
    log_gamma = math.log(float(gamma))

    out_ri = pl.pallas_call(
        functools.partial(_retention_attn_kernel, H=H, Tq=T, Tk=T,
                          log_gamma=log_gamma),
        out_shape=jax.ShapeDtypeStruct((B, S, 2 * H), f32),
        grid_spec=pltpu.PrefetchScalarGridSpec(
            num_scalar_prefetch=0,
            grid=(B, nq, nk),
            in_specs=[
                pl.BlockSpec((1, T, 2 * H), lambda b, qi, ki: (b, qi, 0)),  # Q
                pl.BlockSpec((1, T, 2 * H), lambda b, qi, ki: (b, ki, 0)),  # K
                pl.BlockSpec((1, T, H), lambda b, qi, ki: (b, ki, 0)),      # V
            ],
            out_specs=pl.BlockSpec((1, T, 2 * H),
                                   lambda b, qi, ki: (b, qi, 0)),
            scratch_shapes=[pltpu.VMEM((2 * T, H), f32)]),
        compiler_params=pltpu.CompilerParams(
            dimension_semantics=("parallel", "parallel", "arbitrary")),
    )(q_ri, k_ri, v)

    return lax.complex(out_ri[..., :H], out_ri[..., H:])   # complex64


def _reference(x, w_q, w_k, w_v, theta, gamma):
    """Pure-JAX complex reference mirroring the torch forward()."""
    B, S, H = x.shape
    ctype = jnp.complex64
    xc = x.astype(ctype)
    ns = jnp.arange(1, S + 1, dtype=jnp.float32)
    Theta = jnp.exp(1j * ns[:, None].astype(ctype) * theta.astype(ctype))
    Theta_bar = jnp.conj(Theta)
    n_idx = jnp.arange(S)[:, None]
    m_idx = jnp.arange(S)[None, :]
    D = jnp.where(n_idx >= m_idx,
                  jnp.power(jnp.float32(gamma),
                            (n_idx - m_idx).astype(jnp.float32)),
                  0.0).astype(ctype)
    Q = (xc @ w_q.astype(ctype)) * Theta[None]
    K = (xc @ w_k.astype(ctype)) * Theta_bar[None]
    V = xc @ w_v.astype(ctype)
    att = jnp.einsum('bsh,bth->bst', Q, K) * D[None]
    return jnp.einsum('bst,bth->bsh', att, V)


if __name__ == "__main__":
    hidden_size = 32
    batch = 2
    seq = 8
    gamma = 0.9

    key = jax.random.PRNGKey(0)
    kx, kq, kk, kv, kt = jax.random.split(key, 5)

    x = jax.random.normal(kx, (batch, seq, hidden_size), dtype=jnp.float32)
    # Deterministic parameter init (mirrors torch.randn(...) / hidden_size).
    w_q = jax.random.normal(kq, (hidden_size, hidden_size), jnp.float32) / hidden_size
    w_k = jax.random.normal(kk, (hidden_size, hidden_size), jnp.float32) / hidden_size
    w_v = jax.random.normal(kv, (hidden_size, hidden_size), jnp.float32) / hidden_size
    theta = jax.random.normal(kt, (hidden_size,), jnp.float32) / hidden_size

    out = simple_retention_forward(x, w_q, w_k, w_v, theta, gamma)
    out = jax.block_until_ready(out)

    ref = _reference(x, w_q, w_k, w_v, theta, gamma)
    assert out.shape == (batch, seq, hidden_size)
    assert out.dtype == jnp.complex64
    assert jnp.allclose(out, ref, atol=1e-4, rtol=1e-4)

    print("KERNEL_OK")
</pallas_src>

<mosaic_0001>
module attributes {stable_mosaic.version = 11 : i64} {
  func.func @_proj_kernel(%arg0: i32, %arg1: i32, %arg2: memref<1x8x32xf32, #tpu.memory_space<vmem>>, %arg3: memref<32x96xf32, #tpu.memory_space<vmem>>, %arg4: memref<8x32xf32, #tpu.memory_space<vmem>>, %arg5: memref<8x32xf32, #tpu.memory_space<vmem>>, %arg6: memref<1x8x64xf32, #tpu.memory_space<vmem>>, %arg7: memref<1x8x64xf32, #tpu.memory_space<vmem>>, %arg8: memref<1x8x32xf32, #tpu.memory_space<vmem>>) attributes {dimension_semantics = [#tpu.dimension_semantics<parallel>, #tpu.dimension_semantics<parallel>], iteration_bounds = array<i64: 2, 1>, scalar_prefetch = 0 : i64, scratch_operands = 0 : i64, tpu.core_type = #tpu.core_type<tc>, window_params = [{transform_indices = @transform_0, window_bounds = array<i64: 1, 8, 32>}, {pipeline_mode = #tpu.pipeline_mode<synchronous>, transform_indices = @transform_1, window_bounds = array<i64: 32, 96>}, {transform_indices = @transform_2, window_bounds = array<i64: 8, 32>}, {transform_indices = @transform_3, window_bounds = array<i64: 8, 32>}, {transform_indices = @transform_4, window_bounds = array<i64: 1, 8, 64>}, {transform_indices = @transform_5, window_bounds = array<i64: 1, 8, 64>}, {transform_indices = @transform_6, window_bounds = array<i64: 1, 8, 32>}]} {
    %c0 = arith.constant 0 : index
    %c0_0 = arith.constant 0 : index
    %c0_1 = arith.constant 0 : index
    %0 = vector.load %arg2[%c0, %c0_0, %c0_1] : memref<1x8x32xf32, #tpu.memory_space<vmem>>, vector<1x8x32xf32>
    %1 = vector.shape_cast %0 : vector<1x8x32xf32> to vector<8x32xf32>
    %c0_2 = arith.constant 0 : index
    %c0_3 = arith.constant 0 : index
    %2 = vector.load %arg3[%c0_2, %c0_3] : memref<32x96xf32, #tpu.memory_space<vmem>>, vector<32x96xf32>
    %c0_4 = arith.constant 0 : index
    %c0_5 = arith.constant 0 : index
    %3 = vector.load %arg4[%c0_4, %c0_5] : memref<8x32xf32, #tpu.memory_space<vmem>>, vector<8x32xf32>
    %c0_6 = arith.constant 0 : index
    %c0_7 = arith.constant 0 : index
    %4 = vector.load %arg5[%c0_6, %c0_7] : memref<8x32xf32, #tpu.memory_space<vmem>>, vector<8x32xf32>
    %cst = arith.constant dense<0.000000e+00> : vector<8x96xf32>
    %5 = tpu.matmul %1, %2, %cst {dimension_numbers = #tpu.dot_dimension_numbers<[1], [0], [0], [1], [0, 0, 1, 1], [], []>} : vector<8x32xf32>, vector<32x96xf32>, vector<8x96xf32> -> vector<8x96xf32>
    %6 = vector.extract_strided_slice %5 {offsets = [0, 0], sizes = [8, 32], strides = [1, 1]} : vector<8x96xf32> to vector<8x32xf32>
    %7 = vector.extract_strided_slice %5 {offsets = [0, 32], sizes = [8, 32], strides = [1, 1]} : vector<8x96xf32> to vector<8x32xf32>
    %8 = vector.extract_strided_slice %5 {offsets = [0, 64], sizes = [8, 32], strides = [1, 1]} : vector<8x96xf32> to vector<8x32xf32>
    %9 = arith.mulf %6, %3 : vector<8x32xf32>
    %10 = arith.mulf %6, %4 : vector<8x32xf32>
    %11 = tpu.concatenate %9, %10 in 1 : vector<8x32xf32>, vector<8x32xf32> -> vector<8x64xf32>
    %c0_8 = arith.constant 0 : index
    %c0_9 = arith.constant 0 : index
    %c0_10 = arith.constant 0 : index
    %12 = vector.load %arg6[%c0_8, %c0_9, %c0_10] : memref<1x8x64xf32, #tpu.memory_space<vmem>>, vector<1x8x64xf32>
    %13 = vector.shape_cast %12 : vector<1x8x64xf32> to vector<8x64xf32>
    %14 = vector.shape_cast %11 : vector<8x64xf32> to vector<1x8x64xf32>
    tpu.vector_store %arg6[%c0_8, %c0_9, %c0_10], %14 {strides = array<i32>} : memref<1x8x64xf32, #tpu.memory_space<vmem>>, vector<1x8x64xf32>,
    %15 = arith.mulf %7, %3 : vector<8x32xf32>
    %cst_11 = arith.constant 0.000000e+00 : f32
    %16 = vector.broadcast %cst_11 : f32 to vector<8x32xf32>
    %17 = arith.subf %16, %7 : vector<8x32xf32>
    %18 = arith.mulf %17, %4 : vector<8x32xf32>
    %19 = tpu.concatenate %15, %18 in 1 : vector<8x32xf32>, vector<8x32xf32> -> vector<8x64xf32>
    %c0_12 = arith.constant 0 : index
    %c0_13 = arith.constant 0 : index
    %c0_14 = arith.constant 0 : index
    %20 = vector.load %arg7[%c0_12, %c0_13, %c0_14] : memref<1x8x64xf32, #tpu.memory_space<vmem>>, vector<1x8x64xf32>
    %21 = vector.shape_cast %20 : vector<1x8x64xf32> to vector<8x64xf32>
    %22 = vector.shape_cast %19 : vector<8x64xf32> to vector<1x8x64xf32>
    tpu.vector_store %arg7[%c0_12, %c0_13, %c0_14], %22 {strides = array<i32>} : memref<1x8x64xf32, #tpu.memory_space<vmem>>, vector<1x8x64xf32>,
    %c0_15 = arith.constant 0 : index
    %c0_16 = arith.constant 0 : index
    %c0_17 = arith.constant 0 : index
    %23 = vector.load %arg8[%c0_15, %c0_16, %c0_17] : memref<1x8x32xf32, #tpu.memory_space<vmem>>, vector<1x8x32xf32>
    %24 = vector.shape_cast %23 : vector<1x8x32xf32> to vector<8x32xf32>
    %25 = vector.shape_cast %8 : vector<8x32xf32> to vector<1x8x32xf32>
    tpu.vector_store %arg8[%c0_15, %c0_16, %c0_17], %25 {strides = array<i32>} : memref<1x8x32xf32, #tpu.memory_space<vmem>>, vector<1x8x32xf32>,
    return
  }
  func.func @transform_0(%arg0: i32, %arg1: i32) -> (i32, i32, i32) {
    %c0_i32 = arith.constant 0 : i32
    %c0_i32_0 = arith.constant 0 : i32
    return %arg0, %arg1, %c0_i32 : i32, i32, i32
  }
  func.func @transform_1(%arg0: i32, %arg1: i32) -> (i32, i32) {
    %c0_i32 = arith.constant 0 : i32
    %c0_i32_0 = arith.constant 0 : i32
    %c0_i32_1 = arith.constant 0 : i32
    return %c0_i32, %c0_i32_0 : i32, i32
  }
  func.func @transform_2(%arg0: i32, %arg1: i32) -> (i32, i32) {
    %c0_i32 = arith.constant 0 : i32
    %c0_i32_0 = arith.constant 0 : i32
    return %arg1, %c0_i32 : i32, i32
  }
  func.func @transform_3(%arg0: i32, %arg1: i32) -> (i32, i32) {
    %c0_i32 = arith.constant 0 : i32
    %c0_i32_0 = arith.constant 0 : i32
    return %arg1, %c0_i32 : i32, i32
  }
  func.func @transform_4(%arg0: i32, %arg1: i32) -> (i32, i32, i32) {
    %c0_i32 = arith.constant 0 : i32
    %c0_i32_0 = arith.constant 0 : i32
    return %arg0, %arg1, %c0_i32 : i32, i32, i32
  }
  func.func @transform_5(%arg0: i32, %arg1: i32) -> (i32, i32, i32) {
    %c0_i32 = arith.constant 0 : i32
    %c0_i32_0 = arith.constant 0 : i32
    return %arg0, %arg1, %c0_i32 : i32, i32, i32
  }
  func.func @transform_6(%arg0: i32, %arg1: i32) -> (i32, i32, i32) {
    %c0_i32 = arith.constant 0 : i32
    %c0_i32_0 = arith.constant 0 : i32
    return %arg0, %arg1, %c0_i32 : i32, i32, i32
  }
}

</mosaic_0001>

<bundles_post_ra>
// kernel: tpu_custom_call.1
= control target key start
LH: loop header
LB: loop body
LE: loop exit
PB: predicated region body
PF: predicated region fallthrough
CT: control target
= control target key end

     0   :  { %s1427_s0 = inlined_call_operand.hbm [shape: f32[2,8,32], index: 0, kind: input, shape index: {}]   ;;  %s1428_s1 = inlined_call_operand.hbm [shape: f32[32,96], index: 1, kind: input, shape index: {}]   ;;  %s1429_s2 = inlined_call_operand.hbm [shape: f32[8,32], index: 2, kind: input, shape index: {}]   ;;  %s1430_s3 = inlined_call_operand.hbm [shape: f32[8,32], index: 3, kind: input, shape index: {}]   ;;  %s1431_s4 = inlined_call_operand.hbm [shape: f32[2,8,64], index: 4, kind: output, shape index: {0}]   ;;  %s1432_s5 = inlined_call_operand.hbm [shape: f32[2,8,64], index: 5, kind: output, shape index: {1}]   ;;  %s1433_s6 = inlined_call_operand.hbm [shape: f32[2,8,32], index: 6, kind: output, shape index: {2}]  }
   0x1   :  { %1438 = sst [smem:[#allocation19_spill]] %s1427_s0 }
   0x2   :  { %1439 = sst [smem:[#allocation20_spill]] %s1428_s1 }
   0x3   :  { %1440 = sst [smem:[#allocation21_spill]] %s1429_s2 }
   0x4   :  { %12 = vsyncpa [#allocation3], 0 }
   0x5   :  { %14 = vsyncpa [#allocation3 + $0x1], 0 }
   0x6   :  { %15 = vsyncpa [#allocation6], 0 }
   0x7   :  { %16 = vsyncpa [#allocation9], 0 }
   0x8   :  { %17 = vsyncpa [#allocation4], 0 }
   0x9   :  { %19 = vsyncpa [#allocation4 + $0x1], 0 }
   0xa   :  { %20 = vsyncpa [#allocation12], 0 }
   0xb   :  { %22 = vsyncpa [#allocation12 + $0x1], 0  ;;  %s1154_s21 = smov 0   ;;  %s1156_s22 = smov 0  }
   0xc   :  { %s1158_s23 = smov 0   ;;  %s1160_s24 = smov 0  }
   0xd   :  { %s1162_s25 = smov 0   ;;  %s1164_s26 = smov 0  }
   0xe LB: > { %s1185_s27 = sadd.s32 4294967295, %s1103_s26   ;;  %s1436_s28 = sadd.s32 4294967294, %s1103_s26   ;;  %s1103_s26 = sphi %s1164_s26, %s28_s26   ;;  %s1099_s25 = sphi %s1162_s25, %s1464_s25   ;;  %s1095_s24 = sphi %s1160_s24, %s1463_s24   ;;  %s1091_s23 = sphi %s1158_s23, %s1462_s23   ;;  %s1087_s22 = sphi %s1156_s22, %s1461_s22   ;;  %s1083_s21 = sphi %s1154_s21, %s1460_s21  }
   0xf   : > { %p62_p0 = scmp.ne.s32.totalorder %s1087_s22, %s1083_s21  ;;  %p1434_p1 = scmp.eq.s32.totalorder %s1185_s27, 0 }
  0x10   : > { %p167_p3 = scmp.eq.s32.totalorder %s1436_s28, 1  ;;  %p703_p5 = scmp.ge.s32.totalorder %s1103_s26, 1 }
  0x11   : > { %p1196_p4 = por %p1434_p1, %p62_p0  ;;  %p230_p7 = scmp.lt.s32.totalorder %s1103_s26, 3 }
  0x12   : > { %p1201_p6 = por %p167_p3, %p62_p0  ;;  %s1105_s8 = smov [#allocation5]  }
  0x13   : > { %s1441_s29 = scalar_select %p1196_p4, 1, 0 }
  0x14   : > { %s1442_s30 = scalar_select %p1201_p6, 1, 0 }
  0x15   : > { %p1206_p8 = pnand %p703_p5, %p230_p7  ;;  %s242_s9 = sshll.u32 %s1105_s8, 4  ;;  %s243_s9 = int_to_ptr.vmem [resolvable:$true] %s242_s9 }
  0x16   : > { %s1106_s11 = smov [#allocation7]   ;;  %s1107_s13 = smov [#allocation8]  }
  0x17   : > { %p763_p9 = pneg %p1206_p8  ;;  %s258_s12 = sshll.u32 %s1106_s11, 4  ;;  %s259_s12 = int_to_ptr.vmem [resolvable:$true] %s258_s12 }
  0x18   : > { %s271_s14 = sshll.u32 %s1107_s13, 4  ;;  %s864_s15 = scalar_lea.vmem %s243_s9, 512  ;;  %s272_s14 = int_to_ptr.vmem [resolvable:$true] %s271_s14 }
  0x19   : > { %p1215_p11 = pnand %p763_p9, %p1434_p1  ;;  %p865_p13 = scmp.ne.s32.totalorder %s243_s9, %s864_s15 }
  0x1a   : > { %p872_p5 = scmp.lt.s32.totalorder %s243_s9, %s243_s9  ;;  %p873_p7 = scmp.lt.s32.totalorder %s864_s15, %s864_s15 }
  0x1b   : > { %p855_p12 = pneg %p1215_p11 }
  0x1c   : > { %p874_p9 = por %p873_p7, %p872_p5 }
  0x1d   : > { %p867_p0 = pnand %p865_p13, %p855_p12 }
  0x1f   : > { %p868_p3 = pneg %p867_p0 }
  0x21   : > { %p875_p10 = pnand %p874_p9, %p868_p3 }
  0x23   : > { %878 = shalt.err (!%p875_p10)
}
  0x24   : > { %s1108_s16 = smov 128   ;;  %s1109_s17 = smov 8  }
  0x25   : > { %s1445_s1 = sld [smem:[#allocation20_spill]]  ;;  %s890_s20 = scalar_lea.vmem %s259_s12, 128 }
  0x26   : > { %p891_p1 = scmp.ne.s32.totalorder %s259_s12, %s890_s20  ;;  %p898_p2 = scmp.lt.s32.totalorder %s259_s12, %s259_s12 }
  0x27   : > { %p899_p6 = scmp.lt.s32.totalorder %s890_s20, %s890_s20 }
  0x28   : > { %p893_p13 = pnand %p891_p1, %p855_p12 }
  0x29   : > { %p900_p5 = por %p899_p6, %p898_p2 }
  0x2a   : > { %p894_p0 = pneg %p893_p13 }
  0x2b   : > { %766 = dma.hbm_to_vmem [thread:$0]  (!%p1215_p11), %s1445_s1, 512, %s243_s9, [#allocation6], %s1108_s16, %s1108_s16, %s1109_s17  }
  0x2c   : > { %p901_p3 = pnand %p900_p5, %p894_p0 }
  0x2e   : > { %904 = shalt.err (!%p901_p3)
}
  0x2f   : > { %s1446_s2 = sld [smem:[#allocation21_spill]]  ;;  %s916_s9 = scalar_lea.vmem %s272_s14, 128 }
  0x30   : > { %p917_p10 = scmp.ne.s32.totalorder %s272_s14, %s916_s9  ;;  %p924_p9 = scmp.lt.s32.totalorder %s272_s14, %s272_s14 }
  0x31   : > { %p925_p13 = scmp.lt.s32.totalorder %s916_s9, %s916_s9 }
  0x32   : > { %p919_p7 = pnand %p917_p10, %p855_p12 }
  0x33   : > { %p926_p4 = por %p925_p13, %p924_p9 }
  0x34   : > { %p920_p1 = pneg %p919_p7 }
  0x35   : > { %769 = dma.hbm_to_vmem [thread:$0]  (!%p1215_p11), %s1446_s2, 128, %s259_s12, [#allocation6]  }
  0x36   : > { %p927_p2 = pnand %p926_p4, %p920_p1 }
  0x38   : > { %930 = shalt.err (!%p927_p2)
}
  0x39   : > { %772 = dma.hbm_to_vmem [thread:$0]  (!%p1215_p11), %s1430_s3, 128, %s272_s14, [#allocation9]  }
  0x3a   : > { %s49_s12 = sadd.s32 1, %s1091_s23  ;;  %s40_s16 = sadd.s32 1, %s1099_s25 }
  0x3b   : > { %p56_p4 = scmp.ne.s32.totalorder %s1091_s23, %s1087_s22  ;;  %p42_p6 = scmp.ge.s32.totalorder %s40_s16, 2 }
  0x3c   : > { %p57_p12 = scmp.eq.s32.totalorder %s1103_s26, 0  ;;  %p1447_p0 = scmp.eq.s32.totalorder %s1185_s27, 1 }
  0x3d   : > { %p790_p3 = scmp.lt.s32.totalorder %s1103_s26, 2  ;;  %s1466_s16 = smov (%p42_p6, %s40_s16), 0 }
  0x3e   : > { %p1252_p5 = por %p1447_p0, %p56_p4  ;;  %p58_p10 = por %p57_p12, %p56_p4 }
  0x3f   : > { %s282_s17 = sand.u32 1, %s1091_s23   ;;  %s44_s18 = ssub.s32 %s1099_s25, %s1466_s16 }
  0x40   : > { %p47_p7 = scmp.eq.s32.totalorder %s44_s18, 0  ;;  %s708_s14 = sshll.u32 %s282_s17, 3 }
  0x41   : > { %s709_s19 = sshll.u32 %s1099_s25, 7  ;;  %s1449_s0 = sld [smem:[#allocation19_spill]] }
  0x42   : > { %s1264_s20 = scalar_select %p47_p7, %s1091_s23, %s49_s12  }
  0x43   : > { %s286_s13 = scalar_lea.vmem [#allocation2], %s708_s14  ;;  %p1271_p11 = pnand %p790_p3, %p58_p10 }
  0x44   : > { %s294_s15 = sshll.u32 %s286_s13, 4  ;;  %s283_s1 = scalar_lea.sflag [#allocation3], %s282_s17  ;;  %s295_s15 = int_to_ptr.vmem [resolvable:$true] %s294_s15 }
  0x45   : > { %p933_p1 = pneg %p1271_p11  ;;  %s944_s18 = scalar_lea.vmem %s295_s15, 128 }
  0x46   : > { %p945_p9 = scmp.ne.s32.totalorder %s295_s15, %s944_s18  ;;  %s1110_s12 = smov [#allocation2]  }
  0x47   : > { %s292_s9 = scalar_lea.hbm %s1449_s0, %s709_s19  ;;  %s949_s2 = sshll.u32 %s1110_s12, 4  ;;  %s950_s2 = int_to_ptr.vmem [resolvable:$false] %s949_s2 }
  0x48   : > { %p947_p13 = pnand %p945_p9, %p933_p1  ;;  %s951_s19 = scalar_lea.vmem %s950_s2, 256 }
  0x49   : > { %p952_p4 = scmp.lt.s32.totalorder %s295_s15, %s950_s2  ;;  %p953_p6 = scmp.lt.s32.totalorder %s951_s19, %s944_s18 }
  0x4a   : > { %p948_p2 = pneg %p947_p13 }
  0x4b   : > { %p954_p12 = por %p953_p6, %p952_p4 }
  0x4d   : > { %p955_p0 = pnand %p954_p12, %p948_p2 }
  0x4f   : > { %958 = shalt.err (!%p955_p0)
}
  0x50   : > { %776 = dma.hbm_to_vmem [thread:$0]  (!%p1271_p11), %s292_s9, 128, %s295_s15, %s283_s1  }
  0x51   : > { %303 = sbr.rel (%p1206_p8) target bundleno = 470 (0x1d6), region = 36  ;;  %s1282_s17 = sand.u32 (!%p1206_p8), 1, %s1087_s22  }
  0x52   : > { %s1285_s14 = sshll.u32 (!%p1206_p8), %s1282_s17, 3  ;;  %s306_s2 = scalar_lea.sflag (!%p1206_p8), [#allocation3], %s1282_s17 }
  0x53   : > { %s309_s8 = scalar_lea.vmem (!%p1206_p8), [#allocation2], %s1285_s14  ;;  %p1451_p3 = scmp.ne.s32.totalorder (!%p1206_p8), %s1441_s29, 0 }
  0x56   : > { %1062 = dma.done.wait (%p1451_p3), %s306_s2, 128  }
  0x57   : > { %1064 = vsyncadd (%p1451_p3), %s306_s2, 4294967168  ;;  %p1452_p10 = scmp.eq.s32.totalorder %s1185_s27, 0 }
  0x59   : > { %1066 = dma.done.wait (%p1452_p10), [#allocation6], 640   ;;  %p1453_p8 = pmov %p1452_p10 }
  0x5b   : > { %1068 = vsyncadd (%p1453_p8), [#allocation6], 4294966656  ;;  %p1454_p7 = pmov %p1453_p8 }
  0x5d   : > { %1070 = dma.done.wait (%p1454_p7), [#allocation9], 128   ;;  %p1455_p11 = pmov %p1454_p7 }
  0x5e   : > { %v1111_v0 = vmov 0.0   ;;  %vm1112_vm0 = vmmov 0   ;;  %v364_v1 = vld [vmem:[#allocation5 + $0x18] sm:$0xff]  ;;  %v363_v2 = vld [vmem:[#allocation5 + $0x10] sm:$0xff]  ;;  %v365_v3 = vld [vmem:[#allocation7] sm:$0xff]  ;;  %s1113_s1 = smov 32  }
  0x5f   : > { %1072 = vsyncadd (%p1455_p11), [#allocation9], 4294967168  ;;  %732 = vmatprep.subr.mxu0 %v1111_v0  ;;  %740 = vmatprep.mubr.msk.f32.mxu0 %vm1112_vm0, %v1111_v0  ;;  %v362_v4 = vld [vmem:[#allocation5 + $0x8] sm:$0xff]  ;;  %v361_v6 = vld [vmem:[#allocation5] sm:$0xff]  ;;  %vm367_vm1 = vcmask 261120   ;;  %s1114_s28 = smov 64  }
  0x60   : > { %733 = vmatpush3.msra.mxu0 %v364_v1  ;;  %451 = vrot.lane.b32.xlu0 %v365_v3, %s1113_s1  ;;  %v366_v5 = vld [vmem:[#allocation8] sm:$0xff]  ;;  %v360_v7 = vld [vmem:[%s309_s8] sm:$0xff]  ;;  %s1115_s29 = smov 96   ;;  %s477_s7 = sand.u32 1, %s1185_s27   ;;  %vm448_vm2 = vcmask 523264  }
  0x61   : > { %734 = vmatprep.subr.mxu0 %v1111_v0  ;;  %s722_s11 = sshll.u32 %s1095_s24, 7  ;;  %s352_s9 = scalar_lea.vmem [#allocation11], %s1285_s14 }
  0x62   : > { %735 = vmatpush3.msra.mxu0 %v363_v2  ;;  %s511_s13 = sshll.u32 %s352_s9, 4  ;;  %s359_s15 = scalar_lea.vmem [#allocation13], %s1285_s14  ;;  %s1315_s13 = int_to_ptr.vmem [resolvable:$true] %s511_s13 }
  0x63   : > { %736 = vmatprep.subr.mxu0 %v1111_v0  ;;  %s525_s18 = sshll.u32 %s359_s15, 4  ;;  %s1310_s2 = scalar_lea.hbm %s1432_s5, %s722_s11  ;;  %s1323_s18 = int_to_ptr.vmem [resolvable:$true] %s525_s18 }
  0x64   : > { %737 = vmatpush3.msra.mxu0 %v362_v4  ;;  %457 = vrot.lane.b32.xlu0 %v366_v5, %s1113_s1  ;;  %s1437_s8 = scalar_lea.vmem [#allocation10], %s1285_s14  ;;  %s1329_s12 = scalar_lea.hbm %s1431_s4, %s722_s11 }
  0x65   : > { %738 = vmatprep.subr.mxu0 %v1111_v0  ;;  %s1333_s19 = scalar_lea.sflag [#allocation12], %s477_s7  ;;  %s1116_s24 = smov [#allocation11]  }
  0x66   : > { %739 = vmatpush3.msra.mxu0 %v361_v6  ;;  %s963_s27 = sshll.u32 %s1116_s24, 4  ;;  %s964_s27 = int_to_ptr.vmem [resolvable:$false] %s963_s27 }
  0x67   : > { %741 = vmatmul.mubr.msk.f32.vlgmr.msra.gmra.mxu0 %vm367_vm1, %v360_v7  ;;  %s965_s0 = scalar_lea.vmem %s964_s27, 256  ;;  %p966_p2 = scmp.lt.s32.totalorder %s1315_s13, %s964_s27 }
  0xd2   : > { %v452_v8 = vpop.permute.xlu0 %451 }
  0xd6   : > { %v458_v13 = vpop.permute.xlu0 %457 }
 0x127   : > { %v437_v9 = vpop.f32.mrf.mxu0 }
 0x128   : > { %468 = vrot.lane.b32.xlu0 %v437_v9, %s1114_s28  ;;  %v454_v10 = vmul.f32 %v452_v8, %v437_v9  ;;  %v442_v12 = vmul.f32 %v437_v9, %v366_v5  ;;  %v455_v14 = vsub.f32 0.0, %v437_v9  ;;  %s1321_s28 = scalar_lea.hbm %s1433_s6, %s722_s11  ;;  %v441_v19 = vmul.f32 %v437_v9, %v365_v3 }
 0x129   : > { %v742_v11 = vpop.f32.mrf.mxu0 }
 0x12a   : > { %462 = vrot.lane.b32.xlu1 %v454_v10, %s1115_s29  ;;  %v460_v16 = vmul.f32 %v458_v13, %v455_v14 }
 0x12e   : > { %444 = vrot.lane.b32.xlu1 %v442_v12, %s1113_s1  ;;  %s497_s1 = sshll.u32 %s1437_s8, 4  ;;  %s959_s8 = scalar_lea.vmem %s1315_s13, 128  ;;  %s1331_s1 = int_to_ptr.vmem [resolvable:$true] %s497_s1 }
 0x12f   : > { %p960_p1 = scmp.ne.s32.totalorder %s1315_s13, %s959_s8  ;;  %p967_p4 = scmp.lt.s32.totalorder %s965_s0, %s959_s8 }
 0x131   : > { %p961_p9 = pnand %p960_p1, %p1252_p5  ;;  %p968_p6 = por %p967_p4, %p966_p2 }
 0x133   : > { %p962_p13 = pneg %p961_p9 }
 0x135   : > { %p969_p12 = pnand %p968_p6, %p962_p13 }
 0x19a   : > { %v469_v15 = vpop.permute.xlu0 %468 }
 0x19b   : > { %471 = vst.msk [vmem:[%s359_s15] sm:$0xff] %vm367_vm1, %v469_v15 }
 0x19c   : > { %v463_v17 = vpop.permute.xlu1 %462 }
 0x19d   : > { %v465_v18 = vsel %vm367_vm1, %v463_v17, %v460_v16 }
 0x19e   : > { %466 = vst.msk [vmem:[%s352_s9] sm:$0xff] %vm448_vm2, %v465_v18 }
 0x19f   : > { %972 = shalt.err (!%p969_p12)
}
 0x1a0   : > { %s973_s7 = scalar_lea.hbm %s1310_s2, 128  ;;  %s977_s29 = scalar_lea.hbm %s1432_s5, 256 }
 0x1a1   : > { %p974_p0 = scmp.ne.s32.totalorder %s1310_s2, %s973_s7  ;;  %p978_p8 = scmp.lt.s32.totalorder %s1310_s2, %s1432_s5 }
 0x1a2   : > { %p979_p7 = scmp.lt.s32.totalorder %s977_s29, %s973_s7 }
 0x1a3   : > { %p975_p3 = pnand %p974_p0, %p1252_p5 }
 0x1a4   : > { %p980_p11 = por %p979_p7, %p978_p8 }
 0x1a5   : > { %p976_p10 = pneg %p975_p3 }
 0x1a7   : > { %p981_p1 = pnand %p980_p11, %p976_p10 }
 0x1a9   : > { %984 = shalt.err (!%p981_p1)
}
 0x1aa   : > { %758 = dma.vmem_to_hbm [thread:$0]  (%p1252_p5), %s1315_s13, 128, %s1310_s2, %s1333_s19   ;;  %v445_v20 = vpop.permute.xlu1 %444 }
 0x1ab   : > { %s985_s0 = scalar_lea.vmem %s1323_s18, 128  ;;  %s1117_s8 = smov [#allocation13]  }
 0x1ac   : > { %p986_p9 = scmp.ne.s32.totalorder %s1323_s18, %s985_s0  ;;  %s989_s27 = sshll.u32 %s1117_s8, 4  ;;  %s990_s27 = int_to_ptr.vmem [resolvable:$false] %s989_s27 }
 0x1ad   : > { %s991_s7 = scalar_lea.vmem %s990_s27, 256  ;;  %p992_p4 = scmp.lt.s32.totalorder %s1323_s18, %s990_s27 }
 0x1ae   : > { %p987_p13 = pnand %p986_p9, %p1252_p5  ;;  %p993_p6 = scmp.lt.s32.totalorder %s991_s7, %s985_s0 }
 0x1b0   : > { %p988_p2 = pneg %p987_p13  ;;  %p994_p12 = por %p993_p6, %p992_p4 }
 0x1b2   : > { %p995_p0 = pnand %p994_p12, %p988_p2 }
 0x1b4   : > { %998 = shalt.err (!%p995_p0)
}
 0x1b5   : > { %s999_s13 = scalar_lea.hbm %s1321_s28, 128  ;;  %s1003_s9 = scalar_lea.hbm %s1433_s6, 256 }
 0x1b6   : > { %p1000_p3 = scmp.ne.s32.totalorder %s1321_s28, %s999_s13  ;;  %p1004_p7 = scmp.lt.s32.totalorder %s1321_s28, %s1433_s6 }
 0x1b7   : > { %p1005_p11 = scmp.lt.s32.totalorder %s1003_s9, %s999_s13 }
 0x1b8   : > { %p1001_p10 = pnand %p1000_p3, %p1252_p5 }
 0x1b9   : > { %p1006_p1 = por %p1005_p11, %p1004_p7 }
 0x1ba   : > { %p1002_p8 = pneg %p1001_p10 }
 0x1bc   : > { %p1007_p9 = pnand %p1006_p1, %p1002_p8 }
 0x1be   : > { %1010 = shalt.err (!%p1007_p9)
}
 0x1bf   : > { %759 = dma.vmem_to_hbm [thread:$0]  (%p1252_p5), %s1323_s18, 128, %s1321_s28, %s1333_s19   ;;  %v447_v21 = vsel %vm367_vm1, %v441_v19, %v445_v20 }
 0x1c0   : > { %s1456_s24 = scalar_lea.vmem [#allocation10], %s1285_s14  ;;  %s473_s0 = scalar_lea.sflag [#allocation4], %s1282_s17 }
 0x1c1   : > { %449 = vst.msk [vmem:[%s1456_s24] sm:$0xff] %vm448_vm2, %v447_v21  ;;  %s1011_s8 = scalar_lea.vmem %s1331_s1, 128  ;;  %s1118_s27 = smov [#allocation10]  }
 0x1c2   : > { %p1012_p13 = scmp.ne.s32.totalorder %s1331_s1, %s1011_s8  ;;  %s1015_s7 = sshll.u32 %s1118_s27, 4  ;;  %s1016_s7 = int_to_ptr.vmem [resolvable:$false] %s1015_s7 }
 0x1c3   : > { %s1017_s13 = scalar_lea.vmem %s1016_s7, 256  ;;  %p1018_p6 = scmp.lt.s32.totalorder %s1331_s1, %s1016_s7 }
 0x1c4   : > { %p1013_p2 = pnand %p1012_p13, %p1252_p5  ;;  %p1019_p12 = scmp.lt.s32.totalorder %s1017_s13, %s1011_s8 }
 0x1c6   : > { %p1014_p4 = pneg %p1013_p2  ;;  %p1020_p0 = por %p1019_p12, %p1018_p6 }
 0x1c8   : > { %p1021_p3 = pnand %p1020_p0, %p1014_p4 }
 0x1ca   : > { %1024 = shalt.err (!%p1021_p3)
}
 0x1cb   : > { %s1025_s14 = scalar_lea.hbm %s1329_s12, 128  ;;  %s1029_s28 = scalar_lea.hbm %s1431_s4, 256 }
 0x1cc   : > { %p1026_p10 = scmp.ne.s32.totalorder %s1329_s12, %s1025_s14  ;;  %p1030_p11 = scmp.lt.s32.totalorder %s1329_s12, %s1431_s4 }
 0x1cd   : > { %p1031_p1 = scmp.lt.s32.totalorder %s1029_s28, %s1025_s14 }
 0x1ce   : > { %p1027_p8 = pnand %p1026_p10, %p1252_p5 }
 0x1cf   : > { %p1032_p9 = por %p1031_p1, %p1030_p11 }
 0x1d0   : > { %p1028_p7 = pneg %p1027_p8 }
 0x1d2   : > { %p1033_p13 = pnand %p1032_p9, %p1028_p7 }
 0x1d4   : > { %1036 = shalt.err (!%p1033_p13)
}
 0x1d5   : > { %757 = dma.vmem_to_hbm [thread:$0]  (%p1252_p5), %s1331_s1, 128, %s1329_s12, %s473_s0  }
 0x1d6 PF: > { %s537_s11 = sand.u32 1, %s1083_s21   ;;  %p1457_p2 = scmp.ne.s32.totalorder %s1442_s30, 0 }
 0x1d7   : > { %p1458_p4 = scmp.ge.s32.totalorder %s1103_s26, 2  ;;  %s538_s9 = scalar_lea.sflag [#allocation4], %s537_s11 }
 0x1d9   : > { %p778_p6 = pnand %p1458_p4, %p1457_p2 }
 0x1db   : > { %p779_p12 = pneg %p778_p6 }
 0x1dd   : > { %1074 = dma.done.wait (%p779_p12), %s538_s9, 128  }
 0x1de   : > { %1076 = vsyncadd (%p779_p12), %s538_s9, 4294967168  ;;  %s1459_s29 = sadd.s32 4294967294, %s1103_s26  }
 0x1df   : > { %s546_s15 = sand.u32 1, %s1459_s29  }
 0x1e0   : > { %s547_s24 = scalar_lea.sflag [#allocation12], %s546_s15 }
 0x1e1   : > { %1078 = dma.done.wait (%p779_p12), %s547_s24, 256  }
 0x1e2   : > { %1080 = vsyncadd (%p779_p12), %s547_s24, 4294967040  ;;  %s28_s26 = sadd.s32 1, %s1103_s26   ;;  %s1460_s21 = smov %s1087_s22 }
 0x1e3   : > { %p25_p5 = scmp.ge.s32.totalorder %s28_s26, 4   ;;  %s1461_s22 = smov %s1091_s23 }
 0x1e4   : > { %s1462_s23 = smov %s1264_s20  ;;  %s1463_s24 = smov %s1099_s25 }
 0x1e5   : > { %s1464_s25 = smov %s1466_s16  ;;  %27 = sbr.rel (!%p25_p5) target bundleno = 14 (0xe), region = 127 }
 0x1ea   :  { %561 = vsyncpa [#allocation3], 1 }
 0x1eb   :  { %563 = vsyncpa [#allocation3 + $0x1], 1 }
 0x1ec   :  { %564 = vsyncpa [#allocation6], 1 }
 0x1ed   :  { %565 = vsyncpa [#allocation9], 1 }
 0x1ee   :  { %566 = vsyncpa [#allocation4], 1 }
 0x1ef   :  { %568 = vsyncpa [#allocation4 + $0x1], 1 }
 0x1f0   :  { %569 = vsyncpa [#allocation12], 1 }
 0x1f1   :  { %571 = vsyncpa [#allocation12 + $0x1], 1 }

</bundles_post_ra>
